<compile_context>
chip_gen: v7x
topology: tpu7x:2x2x1
jax: 0.10.0
libtpu: 0.0.40
codegen_flags: <defaults>
</compile_context>

<pallas_src>
from functools import partial

import numpy as np
import jax
import jax.numpy as jnp
from jax import lax
from jax.experimental import pallas as pl
from jax.experimental.pallas import tpu as pltpu


# Raise the scoped-VMEM limit (v5e default is only 16 MiB).  On v7x (64 MiB physical VMEM)
# re-budget ts_target / p_target (and consider single-buffering the batch-invariant group-kernel
# inputs) instead of raising this further.
VMEM_LIMIT = 64 * 1024 * 1024


# ---------------------------------------------------------------------------
# helpers
# ---------------------------------------------------------------------------
def _pick_tile(total, target, mult=8):
    """Largest divisor of `total` <= target that is a multiple of `mult`, else the full extent."""
    target = max(1, min(total, target))
    for t in range(target, 0, -1):
        if total % t == 0 and t % mult == 0:
            return t
    return total


def _fold_shape(n):
    """Fold N points into an (R, C) layout that fills all 8 vreg sublanes."""
    return (8, n // 8) if n % 8 == 0 else (1, n)


def _bn_fold(s_sum, s_sumsq, count, gamma, beta, eps=1e-5):
    """Fold training-mode BatchNorm into y*scale + shift from sum / sum-of-squares."""
    # TODO(synk): single-pass variance (sumsq/N - mean^2) can cancel when |mean| >> std (trained
    # weights); switch to a shifted / two-pass accumulation if that regime matters.
    mean = s_sum / count
    var = jnp.maximum(s_sumsq / count - mean * mean, 0.0)
    scale = gamma * lax.rsqrt(var + eps)
    shift = beta - mean * scale
    return scale, shift


# ---------------------------------------------------------------------------
# Kernel 1: farthest point sampling (one batch element per grid step)
# ---------------------------------------------------------------------------
def _fps_kernel(xyz_cl_ref, xyz_f_ref, newxyz_ref, dist_ref):
    # xyz_cl_ref [1,N,3] (row-gatherable), xyz_f_ref [1,3,R,C] (folded coords),
    # newxyz_ref [1,S,3], dist_ref [R,C] scratch.
    R, C = dist_ref.shape
    N = R * C
    S = newxyz_ref.shape[1]
    flat = (lax.broadcasted_iota(jnp.int32, (R, C), 0) * C
            + lax.broadcasted_iota(jnp.int32, (R, C), 1))
    dist_ref[...] = jnp.full((R, C), 1e10, jnp.float32)

    def body(i, far):
        cen = xyz_cl_ref[0, pl.ds(far, 1), :]               # [1, 3] current centroid
        # TODO(synk): this tiny 3-lane store per step could be replaced by an SMEM index log plus
        # an outside gather; kept in-loop since its cost is negligible vs the distance update.
        newxyz_ref[0, pl.ds(i, 1), :] = cen
        d = jnp.zeros((R, C), jnp.float32)
        for cc in range(3):
            diff = xyz_f_ref[0, cc] - cen[:, cc:cc + 1]      # [R,C] - [1,1]
            d = d + diff * diff
        dist = jnp.minimum(dist_ref[...], d)
        dist_ref[...] = dist
        m = jnp.max(dist)                                    # first-occurrence argmax
        far_new = jnp.min(jnp.where(dist == m, flat, N)).astype(jnp.int32)
        return far_new

    # TODO(synk): torch uses torch.randint for the initial farthest index; deterministic start at
    # index 0 here (the torch forward is otherwise stochastic).
    lax.fori_loop(0, S, body, jnp.int32(0))


def fps(xyz_cl, xyz_f, npoint):
    B, N, _ = xyz_cl.shape
    R, C = xyz_f.shape[2], xyz_f.shape[3]
    return pl.pallas_call(
        _fps_kernel,
        out_shape=jax.ShapeDtypeStruct((B, npoint, 3), jnp.float32),
        grid_spec=pltpu.PrefetchScalarGridSpec(
            num_scalar_prefetch=0,
            grid=(B,),
            in_specs=[
                pl.BlockSpec((1, N, 3), lambda b: (b, 0, 0)),
                pl.BlockSpec((1, 3, R, C), lambda b: (b, 0, 0, 0)),
            ],
            out_specs=pl.BlockSpec((1, npoint, 3), lambda b: (b, 0, 0)),
            scratch_shapes=[pltpu.VMEM((R, C), jnp.float32)]),
        compiler_params=pltpu.CompilerParams(
            dimension_semantics=("parallel",), vmem_limit_bytes=VMEM_LIMIT),
    )(xyz_cl, xyz_f)


# ---------------------------------------------------------------------------
# Kernel 2: knn grouping + one-hot gather fused with the first 1x1 conv
# ---------------------------------------------------------------------------
def _group_kernel(nx_ref, xyzr_ref, xyzcl_ref, pts_ref, w1x_ref, w1p_ref,
                  y_ref, stat_ref, onehot_scr, *, pack_keys):
    nsample, ts, C1 = y_ref.shape
    nx = nx_ref[0]                                           # [ts, 3] centroid tile
    xr = xyzr_ref[0]                                         # [3, N]
    N = xr.shape[1]
    cdt = onehot_scr.dtype                                   # compute dtype (bf16 or f32)

    # layer-1 features of every source point, computed ONCE per tile (f32), so the k-loop below
    # contains no matmuls at all.
    fw = (jnp.dot(xyzcl_ref[0], w1x_ref[...], preferred_element_type=jnp.float32)
          + jnp.dot(pts_ref[0], w1p_ref[...], preferred_element_type=jnp.float32))   # [N, C1]
    nxw = jnp.dot(nx, w1x_ref[...], preferred_element_type=jnp.float32)              # [ts, C1]

    # squared distances on the MXU (f32): ||q||^2 + ||p||^2 - 2 q.p
    nx2 = jnp.sum(nx * nx, axis=1, keepdims=True)            # [ts, 1]
    x2 = jnp.sum(xr * xr, axis=0, keepdims=True)             # [1, N]
    cross = jnp.dot(nx, xr, preferred_element_type=jnp.float32)
    d = jnp.maximum(nx2 + x2 - 2.0 * cross, 0.0)             # [ts, N], >= 0

    col = lax.broadcasted_iota(jnp.int32, (ts, N), 1)

    if pack_keys:
        # ONE XLU reduction per neighbor: pack (distance, column) into a single monotonic int key.
        # Drops the low ceil(log2(N)) mantissa bits of the distance (near-ties break by index).
        nbits = max(int(np.ceil(np.log2(max(N, 2)))), 1)
        dbits = pltpu.bitcast(d, jnp.int32)                  # monotonic for non-negative f32
        keys = ((dbits >> nbits) << nbits) + col             # all keys distinct per row
        imax = jnp.int32(np.iinfo(np.int32).max)

        def select_one(keys, k_off):
            kmin = jnp.min(keys, axis=1, keepdims=True)      # single cross-lane reduce
            sel = keys == kmin                               # exactly one hit per row
            onehot_scr[pl.ds(k_off, ts), :] = sel.astype(cdt)
            return jnp.where(sel, imax, keys)

        if nsample <= 16:
            for k in range(nsample):
                keys = select_one(keys, k * ts)
        else:                                                # bound live ranges for large nsample
            keys = lax.fori_loop(0, nsample,
                                 lambda k, ks: select_one(ks, k * ts), keys)
    else:
        # exact variant (matches stable-argsort tie handling): min + first-argmin per neighbor.
        big = jnp.float32(3.0e38)

        def select_one(d_work, k_off):
            mink = jnp.min(d_work, axis=1, keepdims=True)
            amin = jnp.min(jnp.where(d_work == mink, col, N), axis=1, keepdims=True)
            sel = col == amin
            onehot_scr[pl.ds(k_off, ts), :] = sel.astype(cdt)
            return jnp.where(sel, big, d_work)

        if nsample <= 16:
            d_work = d
            for k in range(nsample):
                d_work = select_one(d_work, k * ts)
        else:
            lax.fori_loop(0, nsample, lambda k, dw: select_one(dw, k * ts), d)

    # one big, well-shaped gather matmul fused with conv layer 1 (bf16 MXU, f32 accumulate)
    g = jnp.dot(onehot_scr[...], fw.astype(cdt),
                preferred_element_type=jnp.float32)           # [nsample*ts, C1]
    y3 = g.reshape(nsample, ts, C1) - nxw[None, :, :]         # (gx - nx)@W[:3] + gp@W[3:]
    y_ref[...] = y3.astype(y_ref.dtype)

    y2 = y3.reshape(nsample * ts, C1)
    stat_ref[0, 0, 0:1, :] = jnp.sum(y2, axis=0, keepdims=True)
    stat_ref[0, 0, 1:2, :] = jnp.sum(y2 * y2, axis=0, keepdims=True)


def group_and_first_layer(new_xyz, xyz_r, xyz_cl, points, w1x, w1p,
                          nsample, ts, compute_dtype, pack_keys):
    B, S, _ = new_xyz.shape
    N = xyz_cl.shape[1]
    D = points.shape[2]
    C1 = w1x.shape[1]
    nS = S // ts
    P = B * S
    return pl.pallas_call(
        partial(_group_kernel, pack_keys=pack_keys),
        out_shape=(jax.ShapeDtypeStruct((nsample, P, C1), compute_dtype),
                   jax.ShapeDtypeStruct((B, nS, 2, C1), jnp.float32)),
        grid_spec=pltpu.PrefetchScalarGridSpec(
            num_scalar_prefetch=0,
            grid=(B, nS),
            in_specs=[
                pl.BlockSpec((1, ts, 3), lambda b, s: (b, s, 0)),
                # TODO(synk): on v7x (64 MiB VMEM) these batch-invariant, full-N blocks should be
                # single-buffered (pipeline_mode=pl.Buffered(1)) and/or ts shrunk; default-buffered
                # here since v5e/v6e have 128 MiB.
                pl.BlockSpec((1, 3, N), lambda b, s: (b, 0, 0)),
                pl.BlockSpec((1, N, 3), lambda b, s: (b, 0, 0)),
                pl.BlockSpec((1, N, D), lambda b, s: (b, 0, 0)),
                pl.BlockSpec((3, C1), lambda b, s: (0, 0)),
                pl.BlockSpec((D, C1), lambda b, s: (0, 0)),
            ],
            out_specs=(
                pl.BlockSpec((nsample, ts, C1), lambda b, s: (0, b * nS + s, 0)),
                pl.BlockSpec((1, 1, 2, C1), lambda b, s: (b, s, 0, 0)),
            ),
            scratch_shapes=[pltpu.VMEM((nsample * ts, N), compute_dtype)]),
        compiler_params=pltpu.CompilerParams(
            dimension_semantics=("parallel", "parallel"),
            vmem_limit_bytes=VMEM_LIMIT),
    )(new_xyz, xyz_r, xyz_cl, points, w1x, w1p)


# ---------------------------------------------------------------------------
# Kernel 3: folded BN + ReLU + next 1x1 conv (tiled over the point dimension)
# ---------------------------------------------------------------------------
def _mid_kernel(y_ref, scale_ref, shift_ref, w_ref, out_ref, stat_ref):
    K, TP, cin = y_ref.shape
    h = jnp.maximum(y_ref[...].astype(jnp.float32) * scale_ref[...] + shift_ref[...], 0.0)
    h2 = h.reshape(K * TP, cin).astype(w_ref.dtype)                     # bf16 MXU operand
    yn = jnp.dot(h2, w_ref[...], preferred_element_type=jnp.float32)    # [K*TP, Cout] f32
    out_ref[...] = yn.reshape(K, TP, -1).astype(out_ref.dtype)
    stat_ref[0, 0:1, :] = jnp.sum(yn, axis=0, keepdims=True)
    stat_ref[0, 1:2, :] = jnp.sum(yn * yn, axis=0, keepdims=True)


def mid_layer(y, scale, shift, W, p_target, mult):
    K, P, Cin = y.shape
    Cout = W.shape[1]
    tp = _pick_tile(P, p_target, mult)
    nP = P // tp
    return pl.pallas_call(
        _mid_kernel,
        out_shape=(jax.ShapeDtypeStruct((K, P, Cout), y.dtype),
                   jax.ShapeDtypeStruct((nP, 2, Cout), jnp.float32)),
        grid_spec=pltpu.PrefetchScalarGridSpec(
            num_scalar_prefetch=0,
            grid=(nP,),
            in_specs=[
                pl.BlockSpec((K, tp, Cin), lambda i: (0, i, 0)),
                pl.BlockSpec((1, Cin), lambda i: (0, 0)),
                pl.BlockSpec((1, Cin), lambda i: (0, 0)),
                pl.BlockSpec((Cin, Cout), lambda i: (0, 0)),
            ],
            out_specs=(
                pl.BlockSpec((K, tp, Cout), lambda i: (0, i, 0)),
                pl.BlockSpec((1, 2, Cout), lambda i: (i, 0, 0)),
            )),
        compiler_params=pltpu.CompilerParams(
            dimension_semantics=("parallel",), vmem_limit_bytes=VMEM_LIMIT),
    )(y, scale, shift, W)


# ---------------------------------------------------------------------------
# Kernel 4: folded BN + ReLU + max over the nsample neighbors
# ---------------------------------------------------------------------------
def _final_kernel(y_ref, scale_ref, shift_ref, out_ref):
    h = jnp.maximum(y_ref[...].astype(jnp.float32) * scale_ref[...] + shift_ref[...], 0.0)
    out_ref[...] = jnp.max(h, axis=0).astype(out_ref.dtype)              # [TP, C]


def final_layer(y, scale, shift, p_target, mult):
    K, P, C = y.shape
    tp = _pick_tile(P, p_target, mult)
    nP = P // tp
    return pl.pallas_call(
        _final_kernel,
        out_shape=jax.ShapeDtypeStruct((P, C), jnp.float32),
        grid_spec=pltpu.PrefetchScalarGridSpec(
            num_scalar_prefetch=0,
            grid=(nP,),
            in_specs=[
                pl.BlockSpec((K, tp, C), lambda i: (0, i, 0)),
                pl.BlockSpec((1, C), lambda i: (0, 0)),
                pl.BlockSpec((1, C), lambda i: (0, 0)),
            ],
            out_specs=pl.BlockSpec((tp, C), lambda i: (i, 0))),
        compiler_params=pltpu.CompilerParams(
            dimension_semantics=("parallel",), vmem_limit_bytes=VMEM_LIMIT),
    )(y, scale, shift)


# ---------------------------------------------------------------------------
# Module wrapper
# ---------------------------------------------------------------------------
def transition_down_forward(xyz, points, params, npoint, nsample,
                            ts_target=128, p_target=1024,
                            compute_dtype=jnp.bfloat16, pack_knn_keys=False):
    """TransitionDown.forward: returns (new_xyz [B,S,3], new_points [B,S,C_last])."""
    xyz = jnp.asarray(xyz, jnp.float32)
    points = jnp.asarray(points, jnp.float32)
    B, N, _ = xyz.shape
    S = npoint
    assert nsample <= N
    xyz_r = jnp.transpose(xyz, (0, 2, 1))                    # [B, 3, N]
    R, C = _fold_shape(N)
    xyz_f = xyz_r.reshape(B, 3, R, C)                        # folded layout for the FPS kernel

    new_xyz = fps(xyz, xyz_f, S)                             # [B, S, 3]

    mult = 16 if jnp.dtype(compute_dtype).itemsize == 2 else 8
    ts = _pick_tile(S, ts_target, mult)
    assert ts % mult == 0 or (B == 1 and ts == S), "centroid tile is not sublane-aligned"

    # Conv bias cancels exactly against the training-mode BN batch-mean subtraction -> dropped.
    W1, _b1, g1, be1 = params[0]
    w1x, w1p = W1[:3], W1[3:]
    y, stats = group_and_first_layer(new_xyz, xyz_r, xyz, points, w1x, w1p,
                                     nsample, ts, compute_dtype, pack_knn_keys)
    M = B * S * nsample
    ssum = jnp.sum(stats, axis=(0, 1))                       # [2, C1]
    scale, shift = _bn_fold(ssum[0:1], ssum[1:2], M, g1, be1)

    for l in range(1, len(params)):
        Wl, _bl, gl, bel = params[l]
        y, stats = mid_layer(y, scale, shift, Wl.astype(compute_dtype), p_target, mult)
        ssum = jnp.sum(stats, axis=0)                        # [2, C_{l+1}]
        scale, shift = _bn_fold(ssum[0:1], ssum[1:2], M, gl, bel)

    out = final_layer(y, scale, shift, p_target, mult)       # [B*S, C_last] f32
    return new_xyz, out.reshape(B, S, -1)


def init_params(key, in_channel, mlp):
    """Deterministic Conv2d(1x1) + BatchNorm2d parameters (torch default init shapes)."""
    params = []
    last = in_channel
    for i, out_c in enumerate(mlp):
        kw, kb = jax.random.split(jax.random.fold_in(key, i))
        bound = 1.0 / np.sqrt(last)
        w = jax.random.uniform(kw, (out_c, last), jnp.float32, -bound, bound)
        b = jax.random.uniform(kb, (out_c,), jnp.float32, -bound, bound)
        params.append((jnp.asarray(w.T),                       # [Cin, Cout]
                       b.reshape(1, -1),
                       jnp.ones((1, out_c), jnp.float32),
                       jnp.zeros((1, out_c), jnp.float32)))
        last = out_c
    return params


# ---------------------------------------------------------------------------
# Pure-JAX reference (mirrors the PyTorch forward) for the correctness check
# ---------------------------------------------------------------------------
def _fps_reference(xyz_b, npoint):
    N = xyz_b.shape[0]

    def body(i, carry):
        dist, far, cent = carry
        c = xyz_b[far]
        cent = cent.at[i].set(c)
        d = jnp.sum((xyz_b - c[None, :]) ** 2, axis=-1)
        dist = jnp.minimum(dist, d)
        far = jnp.argmax(dist).astype(jnp.int32)
        return dist, far, cent

    dist0 = jnp.full((N,), 1e10, jnp.float32)
    cent0 = jnp.zeros((npoint, 3), jnp.float32)
    _, _, cent = lax.fori_loop(0, npoint, body, (dist0, jnp.int32(0), cent0))
    return cent


def reference_forward(xyz, points, params, npoint, nsample, eps=1e-5):
    hi = lax.Precision.HIGHEST
    B, N, _ = xyz.shape
    new_xyz = jax.vmap(lambda xb: _fps_reference(xb, npoint))(xyz)      # [B,S,3]
    nx2 = jnp.sum(new_xyz * new_xyz, axis=-1, keepdims=True)            # [B,S,1]
    x2 = jnp.sum(xyz * xyz, axis=-1)[:, None, :]                        # [B,1,N]
    cross = jnp.einsum('bsc,bnc->bsn', new_xyz, xyz, precision=hi)
    d = nx2 + x2 - 2.0 * cross                                          # [B,S,N]
    idx = jnp.argsort(d, axis=-1)[:, :, :nsample]                       # [B,S,K]
    gxyz = jax.vmap(lambda xb, ib: xb[ib])(xyz, idx) - new_xyz[:, :, None, :]
    gpts = jax.vmap(lambda pb, ib: pb[ib])(points, idx)
    feats = jnp.concatenate([gxyz, gpts], axis=-1)                      # [B,S,K,3+D]
    h = feats.reshape(B * npoint * nsample, -1)
    for (W, bvec, gamma, beta) in params:
        y = jnp.dot(h, W, precision=hi) + bvec
        mean = jnp.mean(y, axis=0, keepdims=True)
        var = jnp.mean((y - mean) ** 2, axis=0, keepdims=True)
        y = (y - mean) * lax.rsqrt(var + eps) * gamma + beta
        h = jnp.maximum(y, 0.0)
    out = jnp.max(h.reshape(B, npoint, nsample, -1), axis=2)            # [B,S,C_last]
    return new_xyz, out


if __name__ == "__main__":
    key = jax.random.PRNGKey(0)
    B, N = 2, 64
    npoint, nsample = 16, 8                   # k, nneighbor
    feat_dim = 13
    channels = [feat_dim + 3, 32, 64]         # TransitionDown(k, nneighbor, channels)

    k1, k2, kp = jax.random.split(key, 3)
    xyz = jax.random.normal(k1, (B, N, 3), jnp.float32)
    points = jax.random.normal(k2, (B, N, feat_dim), jnp.float32)
    params = init_params(kp, channels[0], channels[1:])

    new_xyz, out = transition_down_forward(xyz, points, params, npoint, nsample)
    new_xyz, out = jax.block_until_ready((new_xyz, out))
    assert new_xyz.shape == (B, npoint, 3)
    assert out.shape == (B, npoint, channels[-1])

    ref_xyz, ref_out = reference_forward(xyz, points, params, npoint, nsample)
    np.testing.assert_allclose(np.asarray(new_xyz), np.asarray(ref_xyz),
                               rtol=1e-5, atol=1e-5)
    # bf16 MXU operands + bf16 inter-kernel activations bound the error at ~1e-2.
    np.testing.assert_allclose(np.asarray(out), np.asarray(ref_out),
                               rtol=3e-2, atol=3e-2)
    print("KERNEL_OK")
</pallas_src>

<mosaic_0001>
module attributes {stable_mosaic.version = 11 : i64} {
  func.func @_fps_kernel(%arg0: i32, %arg1: memref<1x64x3xf32, #tpu.memory_space<vmem>>, %arg2: memref<1x3x8x8xf32, #tpu.memory_space<vmem>>, %arg3: memref<1x16x3xf32, #tpu.memory_space<vmem>>, %arg4: memref<8x8xf32, #tpu.memory_space<vmem>>) attributes {dimension_semantics = [#tpu.dimension_semantics<parallel>], iteration_bounds = array<i64: 2>, scalar_prefetch = 0 : i64, scratch_operands = 1 : i64, tpu.core_type = #tpu.core_type<tc>, window_params = [{transform_indices = @transform_0, window_bounds = array<i64: 1, 64, 3>}, {transform_indices = @transform_1, window_bounds = array<i64: 1, 3, 8, 8>}, {transform_indices = @transform_2, window_bounds = array<i64: 1, 16, 3>}]} {
    %0 = tpu.iota {dimensions = array<i32: 0>} : vector<8x8xi32>
    %c8_i32 = arith.constant 8 : i32
    %1 = vector.broadcast %c8_i32 : i32 to vector<8x8xi32>
    %2 = arith.muli %0, %1 : vector<8x8xi32>
    %3 = tpu.iota {dimensions = array<i32: 1>} : vector<8x8xi32>
    %4 = arith.addi %2, %3 : vector<8x8xi32>
    %cst = arith.constant 1.000000e+10 : f32
    %5 = vector.broadcast %cst : f32 to vector<8x8xf32>
    %c0 = arith.constant 0 : index
    %c0_0 = arith.constant 0 : index
    %6 = vector.load %arg4[%c0, %c0_0] : memref<8x8xf32, #tpu.memory_space<vmem>>, vector<8x8xf32>
    tpu.vector_store %arg4[%c0, %c0_0], %5 {strides = array<i32>} : memref<8x8xf32, #tpu.memory_space<vmem>>, vector<8x8xf32>,
    %c0_i32 = arith.constant 0 : i32
    %c0_i32_1 = arith.constant 0 : i32
    %c16_i32 = arith.constant 16 : i32
    %7 = arith.addi %c0_i32_1, %c16_i32 : i32
    %c1_i32 = arith.constant 1 : i32
    %8 = scf.for %arg5 = %c0_i32_1 to %7 step %c1_i32 iter_args(%arg6 = %c0_i32) -> (i32)  : i32 {
      %c0_3 = arith.constant 0 : index
      %9 = arith.index_cast %arg6 : i32 to index
      %c0_4 = arith.constant 0 : index
      %10 = vector.load %arg1[%c0_3, %9, %c0_4] : memref<1x64x3xf32, #tpu.memory_space<vmem>>, vector<1x1x3xf32>
      %11 = vector.shape_cast %10 : vector<1x1x3xf32> to vector<1x3xf32>
      %c0_5 = arith.constant 0 : index
      %12 = arith.index_cast %arg5 : i32 to index
      %c0_6 = arith.constant 0 : index
      %13 = vector.load %arg3[%c0_5, %12, %c0_6] : memref<1x16x3xf32, #tpu.memory_space<vmem>>, vector<1x1x3xf32>
      %14 = vector.shape_cast %13 : vector<1x1x3xf32> to vector<1x3xf32>
      %15 = vector.shape_cast %11 : vector<1x3xf32> to vector<1x1x3xf32>
      tpu.vector_store %arg3[%c0_5, %12, %c0_6], %15 {strides = array<i32>} : memref<1x16x3xf32, #tpu.memory_space<vmem>>, vector<1x1x3xf32>,
      %cst_7 = arith.constant 0.000000e+00 : f32
      %16 = vector.broadcast %cst_7 : f32 to vector<8x8xf32>
      %c0_8 = arith.constant 0 : index
      %c0_9 = arith.constant 0 : index
      %c0_10 = arith.constant 0 : index
      %c0_11 = arith.constant 0 : index
      %17 = vector.load %arg2[%c0_8, %c0_9, %c0_10, %c0_11] : memref<1x3x8x8xf32, #tpu.memory_space<vmem>>, vector<1x1x8x8xf32>
      %18 = vector.shape_cast %17 : vector<1x1x8x8xf32> to vector<8x8xf32>
      %19 = vector.extract_strided_slice %11 {offsets = [0, 0], sizes = [1, 1], strides = [1, 1]} : vector<1x3xf32> to vector<1x1xf32>
      %20 = vector.broadcast %19 : vector<1x1xf32> to vector<8x8xf32>
      %21 = arith.subf %18, %20 : vector<8x8xf32>
      %22 = arith.mulf %21, %21 : vector<8x8xf32>
      %23 = arith.addf %16, %22 : vector<8x8xf32>
      %c0_12 = arith.constant 0 : index
      %c1 = arith.constant 1 : index
      %c0_13 = arith.constant 0 : index
      %c0_14 = arith.constant 0 : index
      %24 = vector.load %arg2[%c0_12, %c1, %c0_13, %c0_14] : memref<1x3x8x8xf32, #tpu.memory_space<vmem>>, vector<1x1x8x8xf32>
      %25 = vector.shape_cast %24 : vector<1x1x8x8xf32> to vector<8x8xf32>
      %26 = vector.extract_strided_slice %11 {offsets = [0, 1], sizes = [1, 1], strides = [1, 1]} : vector<1x3xf32> to vector<1x1xf32>
      %27 = vector.broadcast %26 : vector<1x1xf32> to vector<8x8xf32>
      %28 = arith.subf %25, %27 : vector<8x8xf32>
      %29 = arith.mulf %28, %28 : vector<8x8xf32>
      %30 = arith.addf %23, %29 : vector<8x8xf32>
      %c0_15 = arith.constant 0 : index
      %c2 = arith.constant 2 : index
      %c0_16 = arith.constant 0 : index
      %c0_17 = arith.constant 0 : index
      %31 = vector.load %arg2[%c0_15, %c2, %c0_16, %c0_17] : memref<1x3x8x8xf32, #tpu.memory_space<vmem>>, vector<1x1x8x8xf32>
      %32 = vector.shape_cast %31 : vector<1x1x8x8xf32> to vector<8x8xf32>
      %33 = vector.extract_strided_slice %11 {offsets = [0, 2], sizes = [1, 1], strides = [1, 1]} : vector<1x3xf32> to vector<1x1xf32>
      %34 = vector.broadcast %33 : vector<1x1xf32> to vector<8x8xf32>
      %35 = arith.subf %32, %34 : vector<8x8xf32>
      %36 = arith.mulf %35, %35 : vector<8x8xf32>
      %37 = arith.addf %30, %36 : vector<8x8xf32>
      %c0_18 = arith.constant 0 : index
      %c0_19 = arith.constant 0 : index
      %38 = vector.load %arg4[%c0_18, %c0_19] : memref<8x8xf32, #tpu.memory_space<vmem>>, vector<8x8xf32>
      %39 = arith.minimumf %38, %37 : vector<8x8xf32>
      %c0_20 = arith.constant 0 : index
      %c0_21 = arith.constant 0 : index
      %40 = vector.load %arg4[%c0_20, %c0_21] : memref<8x8xf32, #tpu.memory_space<vmem>>, vector<8x8xf32>
      tpu.vector_store %arg4[%c0_20, %c0_21], %39 {strides = array<i32>} : memref<8x8xf32, #tpu.memory_space<vmem>>, vector<8x8xf32>,
      %41 = vector.shape_cast %39 : vector<8x8xf32> to vector<1x8x8xf32>
      %cst_22 = arith.constant dense<0xFF800000> : vector<1xf32>
      %42 = vector.multi_reduction <maximumf>, %41, %cst_22 [1, 2] : vector<1x8x8xf32> to vector<1xf32>
      %43 = vector.shape_cast %42 : vector<1xf32> to vector<1x1x1xf32>
      %44 = vector.extract %43[0, 0, 0] : f32 from vector<1x1x1xf32>
      %45 = vector.broadcast %44 : f32 to vector<8x8xf32>
      %46 = arith.cmpf oeq, %39, %45 : vector<8x8xf32>
      %c64_i32 = arith.constant 64 : i32
      %47 = vector.broadcast %c64_i32 : i32 to vector<8x8xi32>
      %48 = arith.select %46, %4, %47 : vector<8x8xi1>, vector<8x8xi32>
      %49 = vector.shape_cast %48 : vector<8x8xi32> to vector<1x8x8xi32>
      %cst_23 = arith.constant dense<2147483647> : vector<1xi32>
      %50 = vector.multi_reduction <minsi>, %49, %cst_23 [1, 2] : vector<1x8x8xi32> to vector<1xi32>
      %51 = vector.shape_cast %50 : vector<1xi32> to vector<1x1x1xi32>
      %52 = vector.extract %51[0, 0, 0] : i32 from vector<1x1x1xi32>
      scf.yield %52 : i32
    }
    %c16_i32_2 = arith.constant 16 : i32
    return
  }
  func.func @transform_0(%arg0: i32) -> (i32, i32, i32) {
    %c0_i32 = arith.constant 0 : i32
    %c0_i32_0 = arith.constant 0 : i32
    %c0_i32_1 = arith.constant 0 : i32
    return %arg0, %c0_i32, %c0_i32_0 : i32, i32, i32
  }
  func.func @transform_1(%arg0: i32) -> (i32, i32, i32, i32) {
    %c0_i32 = arith.constant 0 : i32
    %c0_i32_0 = arith.constant 0 : i32
    %c0_i32_1 = arith.constant 0 : i32
    %c0_i32_2 = arith.constant 0 : i32
    return %arg0, %c0_i32, %c0_i32_0, %c0_i32_1 : i32, i32, i32, i32
  }
  func.func @transform_2(%arg0: i32) -> (i32, i32, i32) {
    %c0_i32 = arith.constant 0 : i32
    %c0_i32_0 = arith.constant 0 : i32
    %c0_i32_1 = arith.constant 0 : i32
    return %arg0, %c0_i32, %c0_i32_0 : i32, i32, i32
  }
}

</mosaic_0001>

<bundles_post_ra>
// kernel: tpu_custom_call.1
= control target key start
LH: loop header
LB: loop body
LE: loop exit
PB: predicated region body
PF: predicated region fallthrough
CT: control target
= control target key end

     0   :  { %7 = vsyncpa [#allocation4], 0  ;;  %s942_s0 = inlined_call_operand.hbm [shape: f32[2,64,3], index: 0, kind: input, shape index: {}]   ;;  %s943_s1 = inlined_call_operand.hbm [shape: f32[2,3,8,8], index: 1, kind: input, shape index: {}]   ;;  %s944_s2 = inlined_call_operand.hbm [shape: f32[2,16,3], index: 2, kind: output, shape index: {}]  }
   0x1   :  { %9 = vsyncpa [#allocation4 + $0x1], 0 }
   0x2   :  { %10 = vsyncpa [#allocation7], 0 }
   0x3   :  { %12 = vsyncpa [#allocation7 + $0x1], 0 }
   0x4   :  { %13 = vsyncpa [#allocation5], 0 }
   0x5   :  { %15 = vsyncpa [#allocation5 + $0x1], 0  ;;  %s690_s9 = smov 0   ;;  %s692_s10 = smov 0  }
   0x6   :  { %s694_s11 = smov 0   ;;  %s696_s12 = smov 0  }
   0x7 LB: > { %s711_s13 = sadd.s32 4294967295, %s655_s12   ;;  %s411_s14 = sadd.s32 4294967294, %s655_s12   ;;  %s655_s12 = sphi %s696_s12, %s960_s12   ;;  %s651_s11 = sphi %s694_s11, %s959_s11   ;;  %s647_s10 = sphi %s692_s10, %s958_s10   ;;  %s643_s9 = sphi %s690_s9, %s957_s9  }
   0x8   : > { %s715_s15 = sadd.s32 1, %s655_s12   ;;  %s28_s16 = sadd.s32 1, %s651_s11 }
   0x9   : > { %s25_s17 = ssub.s32 %s655_s12, %s715_s15  ;;  %p35_p0 = scmp.ne.s32.totalorder %s651_s11, %s647_s10 }
   0xa   : > { %p26_p1 = scmp.eq.s32.totalorder %s25_s17, 0  ;;  %p36_p2 = scmp.eq.s32.totalorder %s655_s12, 0 }
   0xb   : > { %p41_p3 = scmp.ne.s32.totalorder %s647_s10, %s643_s9  ;;  %p42_p4 = scmp.eq.s32.totalorder %s711_s13, 0 }
   0xc   : > { %s727_s18 = scalar_select %p26_p1, %s651_s11, %s28_s16  }
   0xd   : > { %p729_p5 = por %p36_p2, %p35_p0  ;;  %p733_p6 = por %p42_p4, %p41_p3 }
   0xe   : > { %p91_p7 = scmp.eq.s32.totalorder %s711_s13, 1  ;;  %p97_p8 = scmp.eq.s32.totalorder %s411_s14, 1 }
   0xf   : > { %s948_s20 = scalar_select %p733_p6, 1, 0 }
  0x10   : > { %p460_p10 = scmp.lt.s32.totalorder %s655_s12, 2  ;;  %p740_p11 = por %p91_p7, %p35_p0 }
  0x11   : > { %p744_p12 = por %p97_p8, %p41_p3  ;;  %s749_s23 = sand.u32 1, %s651_s11  }
  0x12   : > { %s949_s21 = scalar_select %p740_p11, 1, 0 }
  0x13   : > { %s950_s22 = scalar_select %p744_p12, 1, 0 }
  0x14   : > { %s428_s24 = sshll.u32 %s655_s12, 10  ;;  %s414_s25 = sshll.u32 %s749_s23, 6 }
  0x15   : > { %s756_s28 = scalar_lea.hbm %s942_s0, %s428_s24  ;;  %s121_s29 = scalar_lea.vmem [#allocation3], %s414_s25 }
  0x16   : > { %s128_s30 = sshll.u32 %s121_s29, 4  ;;  %p760_p13 = pnand %p460_p10, %p729_p5  ;;  %s764_s30 = int_to_ptr.vmem [resolvable:$true] %s128_s30 }
  0x17   : > { %s118_s4 = scalar_lea.sflag [#allocation4], %s749_s23  ;;  %s517_s5 = scalar_lea.hbm %s756_s28, 1024 }
  0x18   : > { %p518_p0 = scmp.ne.s32.totalorder %s756_s28, %s517_s5  ;;  %p519_p1 = pneg %p760_p13 }
  0x19   : > { %s522_s8 = scalar_lea.hbm %s942_s0, 2048  ;;  %p523_p4 = scmp.lt.u32.totalorder %s756_s28, %s942_s0 }
  0x1a   : > { %p520_p2 = pnand %p519_p1, %p518_p0  ;;  %p524_p5 = scmp.lt.u32.totalorder %s522_s8, %s517_s5 }
  0x1b   : > { %p526_p8 = scmp.lt.u32.totalorder %s517_s5, %s756_s28 }
  0x1c   : > { %p521_p3 = pneg %p520_p2  ;;  %p525_p7 = por %p524_p5, %p523_p4 }
  0x1e   : > { %p527_p10 = por %p526_p8, %p525_p7 }
  0x20   : > { %p528_p9 = pnand %p527_p10, %p521_p3 }
  0x22   : > { %531 = shalt.err (!%p528_p9)
}
  0x23   : > { %s532_s17 = scalar_lea.vmem %s764_s30, 1024  ;;  %s665_s19 = smov [#allocation3]  }
  0x24   : > { %p533_p0 = scmp.ne.s32.totalorder %s764_s30, %s532_s17  ;;  %s537_s24 = sshll.u32 %s665_s19, 4  ;;  %s538_s24 = int_to_ptr.vmem [resolvable:$false] %s537_s24 }
  0x25   : > { %s539_s25 = scalar_lea.vmem %s538_s24, 2048  ;;  %p540_p11 = scmp.lt.s32.totalorder %s764_s30, %s538_s24 }
  0x26   : > { %p535_p2 = pnand %p533_p0, %p519_p1  ;;  %p541_p4 = scmp.lt.s32.totalorder %s539_s25, %s532_s17 }
  0x28   : > { %p536_p12 = pneg %p535_p2  ;;  %p542_p5 = por %p541_p4, %p540_p11 }
  0x2a   : > { %p543_p7 = pnand %p542_p5, %p536_p12 }
  0x2c   : > { %546 = shalt.err (!%p543_p7)
}
  0x2d   : > { %s666_s26 = smov 128   ;;  %s667_s27 = smov 8  }
  0x2e   : > { %452 = dma.hbm_to_vmem [thread:$0]  (!%p760_p13), %s756_s28, 1024, %s764_s30, %s118_s4, %s666_s26, %s666_s26, %s667_s27  }
  0x2f   : > { %p418_p9 = scmp.ge.s32.totalorder %s655_s12, 1  ;;  %p157_p11 = scmp.lt.s32.totalorder %s655_s12, 3 }
  0x30   : > { %s430_s29 = smul.u32 24, %s749_s23  ;;  %s139_s28 = scalar_lea.sflag [#allocation7], %s749_s23 }
  0x31   : > { %p800_p12 = pnand %p418_p9, %p157_p11  ;;  %s431_s6 = smul.u32 384, %s655_s12 }
  0x32   : > { %s142_s16 = scalar_lea.vmem [#allocation6], %s430_s29  ;;  %s552_s24 = scalar_lea.hbm %s943_s1, 768 }
  0x33   : > { %s808_s14 = scalar_lea.hbm %s943_s1, %s431_s6  ;;  %s149_s17 = sshll.u32 %s142_s16, 4  ;;  %s810_s17 = int_to_ptr.vmem [resolvable:$true] %s149_s17 }
  0x34   : > { %s547_s30 = scalar_lea.hbm %s808_s14, 384  ;;  %p553_p0 = scmp.lt.u32.totalorder %s808_s14, %s943_s1 }
  0x35   : > { %p548_p3 = scmp.ne.s32.totalorder %s808_s14, %s547_s30  ;;  %p554_p2 = scmp.lt.u32.totalorder %s552_s24, %s547_s30 }
  0x36   : > { %p556_p5 = scmp.lt.u32.totalorder %s547_s30, %s808_s14 }
  0x37   : > { %p550_p8 = pnand %p548_p3, %p519_p1  ;;  %p555_p4 = por %p554_p2, %p553_p0 }
  0x39   : > { %p551_p10 = pneg %p550_p8  ;;  %p557_p7 = por %p556_p5, %p555_p4 }
  0x3b   : > { %p558_p9 = pnand %p557_p7, %p551_p10 }
  0x3d   : > { %561 = shalt.err (!%p558_p9)
}
  0x3e   : > { %s562_s29 = scalar_lea.vmem %s810_s17, 384  ;;  %s668_s7 = smov [#allocation6]  }
  0x3f   : > { %p563_p11 = scmp.ne.s32.totalorder %s810_s17, %s562_s29  ;;  %s567_s8 = sshll.u32 %s668_s7, 4  ;;  %s568_s8 = int_to_ptr.vmem [resolvable:$false] %s567_s8 }
  0x40   : > { %s569_s16 = scalar_lea.vmem %s568_s8, 768  ;;  %p570_p6 = scmp.lt.s32.totalorder %s810_s17, %s568_s8 }
  0x41   : > { %p565_p3 = pnand %p563_p11, %p519_p1  ;;  %p571_p0 = scmp.lt.s32.totalorder %s569_s16, %s562_s29 }
  0x43   : > { %p566_p8 = pneg %p565_p3  ;;  %p572_p2 = por %p571_p0, %p570_p6 }
  0x45   : > { %p573_p4 = pnand %p572_p2, %p566_p8 }
  0x47   : > { %576 = shalt.err (!%p573_p4)
}
  0x48   : > { %455 = dma.hbm_to_vmem [thread:$0]  (!%p760_p13), %s808_s14, 384, %s810_s17, %s139_s28, %s666_s26, %s666_s26, %s667_s27  }
  0x49   : > { %161 = sbr.rel (%p800_p12) target bundleno = 851 (0x353), region = 28  ;;  %s844_s30 = sand.u32 (!%p800_p12), 1, %s647_s10  }
  0x4a   : > { %s419_s4 = sshll.u32 (!%p800_p12), %s844_s30, 6  ;;  %s164_s19 = scalar_lea.sflag (!%p800_p12), [#allocation4], %s844_s30 }
  0x4b   : > { %s848_s3 = scalar_lea.vmem (!%p800_p12), [#allocation3], %s419_s4  ;;  %p953_p6 = scmp.ne.s32.totalorder (!%p800_p12), %s948_s20, 0 }
  0x50   : > { %630 = dma.done.wait (%p953_p6), %s164_s19, 1024  }
  0x51   : > { %632 = vsyncadd (%p953_p6), %s164_s19, 4294966272  ;;  %s432_s23 = smul.u32 24, %s844_s30  ;;  %s173_s26 = scalar_lea.sflag [#allocation7], %s844_s30 }
  0x53   : > { %s856_s27 = scalar_lea.vmem [#allocation6], %s432_s23 }
  0x54   : > { %634 = dma.done.wait (%p953_p6), %s173_s26, 384  }
  0x55   : > { %636 = vsyncadd (%p953_p6), %s173_s26, 4294966912  ;;  %s420_s5 = sshll.u32 %s844_s30, 4  ;;  %v202_v0 = vlaneseq  ;;  %vm208_vm0 = vcmask 64512   ;;  %v669_v1 = vmov 1e+10   ;;  %s868_s17 = smov 0  }
  0x56   : > { %209 = vst.msk [vmem:[#allocation2] sm:$0xff] %vm208_vm0, %v669_v1  ;;  %s866_s14 = scalar_lea.vmem [#allocation8], %s420_s5  ;;  %s870_s28 = smov 0  }
  0x57   : > { %v203_v2 = vshrl.u32 %v202_v0, 7  ;;  %v206_v3 = vand.u32 127, %v202_v0 }
  0x59   : > { %v204_v4 = vmul.u32 8, %v203_v2 }
  0x5b   : > { %v864_v5 = vadd.s32 %v206_v3, %v204_v4 }
  0x5c LB: >> { %vm220_vm1 = vcmask 16384   ;;  %s217_s20 = scalar_lea.vmem %s848_s3, %s659_s17 [#allocation3]  ;;  %s219_s24 = scalar_lea.vmem %s866_s14, %s663_s28 [#allocation8]  ;;  %v222_v9 = vld [vmem:[%s856_s27] sm:$0xff]  ;;  %v421_v11 = vld [vmem:[%s856_s27 + $0x8] sm:$0xff]  ;;  %v422_v15 = vld [vmem:[%s856_s27 + $0x10] sm:$0xff]  ;;  %s663_s28 = sphi %s870_s28, %s215_s28   ;;  %s659_s17 = sphi %s868_s17, %s442_s17  }
  0x5d   : >> { %v218_v6 = vld [vmem:[%s217_s20] sm:$0x1]  ;;  %s670_s25 = smov 127   ;;  %s671_s6 = smov 126  }
  0x5e   : >> { %232 = vrot.lane.b32.xlu0 %v218_v6, %s670_s25  ;;  %221 = vst.msk [vmem:[%s219_s24] sm:$0x1] %vm220_vm1, %v218_v6  ;;  %v250_v22 = vld [vmem:[#allocation2] sm:$0xff]  ;;  %s215_s28 = sadd.s32 1, %s663_s28  }
  0x5f   : >> { %433 = vpush %v218_v6  ;;  %p212_p13 = scmp.ge.s32.totalorder %s215_s28, 16  }
  0x60   : > { %s429_s4 = sshll.u32 (%p212_p13), %s711_s13, 8  ;;  %s305_s5 = sshll.u32 (%p212_p13), %s866_s14, 4  ;;  %s898_s5 = int_to_ptr.vmem [resolvable:$true] %s305_s5 }
  0x61   : > { %s895_s26 = scalar_lea.hbm (%p212_p13), %s944_s2, %s429_s4  ;;  %s292_s20 = scalar_lea.sflag (%p212_p13), [#allocation5], %s844_s30 }
  0x62   : >> { %242 = vrot.lane.b32.xlu0 %v218_v6, %s671_s6  ;;  %s577_s24 = scalar_lea.vmem (%p212_p13), %s898_s5, 256  ;;  %p954_p12 = scmp.ne.s32.totalorder (%p212_p13), %s949_s21, 0 }
  0x63   : > { %p578_p1 = scmp.ne.s32.totalorder (%p212_p13), %s898_s5, %s577_s24  ;;  %s672_s3 = smov (%p212_p13), [#allocation8]  }
  0x64   : > { %s581_s27 = sshll.u32 (%p212_p13), %s672_s3, 4  ;;  %s582_s27 = int_to_ptr.vmem [resolvable:$false] %s581_s27 }
  0x65   : > { %p579_p10 = pnand (%p212_p13), %p578_p1, %p954_p12  ;;  %s583_s13 = scalar_lea.vmem (%p212_p13), %s582_s27, 512 }
  0x66   : > { %p584_p7 = scmp.lt.s32.totalorder (%p212_p13), %s898_s5, %s582_s27  ;;  %p585_p9 = scmp.lt.s32.totalorder (%p212_p13), %s583_s13, %s577_s24 }
  0x67   : > { %p580_p5 = pneg (%p212_p13), %p579_p10 }
  0x68   : > { %p586_p11 = por (%p212_p13), %p585_p9, %p584_p7 }
  0x6a   : > { %p587_p3 = pnand (%p212_p13), %p586_p11, %p580_p5 }
  0x90   : >> { %s434_s29 = spop %433 }
  0x91   : >> { %v225_v10 = vstv %s434_s29 }
  0x92   : >> { %v227_v12 = vsub.f32 %v222_v9, %v225_v10 }
  0x94   : >> { %v228_v16 = vmul.f32 %v227_v12, %v227_v12 }
  0xd0   : >> { %v233_v7 = vpop.permute.xlu0 %232 }
  0xd1   : >> { %435 = vpush %v233_v7 }
  0xd4   : >> { %v243_v8 = vpop.permute.xlu0 %242 }
  0xd5   : >> { %437 = vpush %v243_v8 }
 0x102   : >> { %s436_s7 = spop %435 }
 0x103   : >> { %v235_v13 = vstv %s436_s7 }
 0x104   : >> { %v237_v14 = vsub.f32 %v421_v11, %v235_v13 }
 0x106   : >> { %v238_v17 = vmul.f32 %v237_v14, %v237_v14  ;;  %s438_s8 = spop %437 }
 0x107   : >> { %v245_v18 = vstv %s438_s8 }
 0x108   : >> { %v247_v19 = vsub.f32 %v422_v15, %v245_v18  ;;  %v239_v20 = vadd.f32 %v238_v17, %v228_v16 }
 0x10a   : >> { %v248_v21 = vmul.f32 %v247_v19, %v247_v19 }
 0x10c   : >> { %v249_v23 = vadd.f32 %v248_v21, %v239_v20 }
 0x10e   : >> { %v251_v24 = vmin.f32 %v250_v22, %v249_v23 }
 0x110   : >> { %v253_v25 = vsel %vm208_vm0, %v251_v24, -inf  ;;  %252 = vst.msk [vmem:[#allocation2] sm:$0xff] %vm208_vm0, %v251_v24 }
 0x111   : >> { %254 = vmax.xlane.f32.xlu1 %v253_v25 }
 0x19e   : >> { %v255_v26 = vpop.xlane.xlu1 %254 }
 0x19f   : >> { %v256_v27 = vrot.slane %v255_v26, 4 }
 0x1a1   : >> { %v257_v28 = vmax.f32 %v255_v26, %v256_v27 }
 0x1a3   : >> { %v258_v29 = vrot.slane %v257_v28, 2 }
 0x1a5   : >> { %v259_v30 = vmax.f32 %v257_v28, %v258_v29 }
 0x1a7   : >> { %v260_v31 = vrot.slane %v259_v30, 1 }
 0x1a9   : >> { %v261_v32 = vmax.f32 %v259_v30, %v260_v31 }
 0x1ab   : >> { %439 = vpush %v261_v32 }
 0x1dc   : >> { %s440_s16 = spop %439 }
 0x1dd   : >> { %v263_v33 = vstv %s440_s16 }
 0x1de   : >> { %vm264_vm2 = vcmp.eq.f32.partialorder %v251_v24, %v263_v33 }
 0x1df   : >> { %v265_v34 = vsel %vm264_vm2, %v864_v5, 64 }
 0x1e0   : >> { %v266_v35 = vsel %vm208_vm0, %v265_v34, 2147483647 }
 0x1e1   : >> { %v268_v36 = vshra.s32 %v266_v35, 16  ;;  %v267_v38 = vand.u32 65535, %v266_v35 }
 0x1e3   : >> { %v270_v37 = vcvt.s32.f32 %v268_v36  ;;  %v269_v40 = vcvt.s32.f32 %v267_v38 }
 0x1e5   : >> { %271 = vmin.xlane.f32.xlu1 %v270_v37 }
 0x272   : >> { %v272_v39 = vpop.xlane.xlu1 %271 }
 0x273   : >> { %vm273_vm3 = vcmp.eq.f32.partialorder %v270_v37, %v272_v39  ;;  %v278_v42 = vcvt.f32.s32 %v272_v39 }
 0x274   : >> { %v274_v41 = vsel %vm273_vm3, %v269_v40, inf }
 0x275   : >> { %275 = vmin.xlane.f32.xlu0 %v274_v41  ;;  %v279_v44 = vshll.u32 %v278_v42, 16 }
 0x302   : >> { %v276_v43 = vpop.xlane.xlu0 %275 }
 0x303   : >> { %v277_v45 = vcvt.f32.s32 %v276_v43 }
 0x305   : >> { %v280_v46 = vadd.s32 %v279_v44, %v277_v45 }
 0x307   : >> { %v281_v47 = vrot.slane %v280_v46, 4 }
 0x309   : >> { %vm282_vm4 = vcmp.lt.s32.totalorder %v280_v46, %v281_v47 }
 0x30a   : >> { %v283_v48 = vsel %vm282_vm4, %v280_v46, %v281_v47 }
 0x30b   : >> { %v284_v49 = vrot.slane %v283_v48, 2 }
 0x30d   : >> { %vm285_vm5 = vcmp.lt.s32.totalorder %v283_v48, %v284_v49 }
 0x30e   : >> { %v286_v50 = vsel %vm285_vm5, %v283_v48, %v284_v49 }
 0x30f   : >> { %v287_v51 = vrot.slane %v286_v50, 1 }
 0x311   : >> { %vm288_vm6 = vcmp.lt.s32.totalorder %v286_v50, %v287_v51 }
 0x312   : >> { %v289_v52 = vsel %vm288_vm6, %v286_v50, %v287_v51 }
 0x313   : >> { %441 = vpush %v289_v52 }
 0x33e   : > { %214 = sbr.rel (!%p212_p13) target bundleno = 92 (0x5c), region = 97 }
 0x344   : >> { %s442_s17 = spop %441  }
 0x345   : > { %590 = shalt.err (!%p587_p3)
}
 0x346   : > { %s591_s14 = scalar_lea.hbm %s895_s26, 256  ;;  %s595_s25 = scalar_lea.hbm %s944_s2, 512 }
 0x347   : > { %p592_p8 = scmp.ne.s32.totalorder %s895_s26, %s591_s14  ;;  %p596_p4 = scmp.lt.u32.totalorder %s895_s26, %s944_s2 }
 0x348   : > { %p597_p6 = scmp.lt.u32.totalorder %s595_s25, %s591_s14  ;;  %p599_p1 = scmp.lt.u32.totalorder %s591_s14, %s895_s26 }
 0x349   : > { %p593_p0 = pnand %p592_p8, %p954_p12 }
 0x34a   : > { %p598_p13 = por %p597_p6, %p596_p4 }
 0x34b   : > { %p594_p2 = pneg %p593_p0 }
 0x34c   : > { %p600_p10 = por %p599_p1, %p598_p13 }
 0x34e   : > { %p601_p5 = pnand %p600_p10, %p594_p2 }
 0x350   : > { %604 = shalt.err (!%p601_p5)
}
 0x351   : > { %s673_s7 = smov 128   ;;  %s674_s8 = smov 8  }
 0x352   : > { %447 = dma.vmem_to_hbm [thread:$0]  (%p954_p12), %s898_s5, 256, %s895_s26, %s292_s20, %s673_s7, %s673_s7, %s674_s8  }
 0x353 PF: > { %s320_s16 = sand.u32 1, %s643_s9   ;;  %p955_p7 = scmp.ne.s32.totalorder %s950_s22, 0 }
 0x354   : > { %p956_p9 = scmp.ge.s32.totalorder %s655_s12, 2  ;;  %s321_s4 = scalar_lea.sflag [#allocation5], %s320_s16 }
 0x356   : > { %p457_p11 = pnand %p956_p9, %p955_p7 }
 0x358   : > { %638 = dma.done.wait (!%p457_p11), %s321_s4, 256  }
 0x359   : > { %640 = vsyncadd (!%p457_p11), %s321_s4, 4294967040  ;;  %p18_p3 = scmp.ge.s32.totalorder %s715_s15, 4   ;;  %s957_s9 = smov %s647_s10 }
 0x35a   : > { %s958_s10 = smov %s651_s11  ;;  %s959_s11 = smov %s727_s18 }
 0x35b   : > { %s960_s12 = smov %s715_s15  ;;  %20 = sbr.rel (!%p18_p3) target bundleno = 7 (0x7), region = 108 }
 0x362   :  { %326 = vsyncpa [#allocation4], 1 }
 0x363   :  { %328 = vsyncpa [#allocation4 + $0x1], 1 }
 0x364   :  { %329 = vsyncpa [#allocation7], 1 }
 0x365   :  { %331 = vsyncpa [#allocation7 + $0x1], 1 }
 0x366   :  { %332 = vsyncpa [#allocation5], 1 }
 0x367   :  { %334 = vsyncpa [#allocation5 + $0x1], 1 }

</bundles_post_ra>
